<compile_context>
chip_gen: v6e
topology: v6e:2x2x1
jax: 0.10.0
libtpu: 0.0.40
codegen_flags: <defaults>
</compile_context>

<pallas_src>
import functools

import jax
import jax.numpy as jnp
from jax.experimental import pallas as pl
from jax.experimental.pallas import tpu as pltpu


_SQRT_HALF = 0.7071067811865476  # 1/sqrt(2)


def _round_up(x, m):
    return ((x + m - 1) // m) * m


def _gelu(h, approximate):
    if approximate:
        # tanh form -> EUP slot (useful on v5e where the erf polynomial loads the VALU)
        return jax.nn.gelu(h, approximate=True)
    # exact erf form: matches torch.nn.GELU() default
    return 0.5 * h * (1.0 + jax.lax.erf(h * _SQRT_HALF))


# ----------------------------- kernels -----------------------------

def _mlp_kernel_resident(x_ref, w1_ref, b1_ref, w2_ref, b2_ref, o_ref, *,
                         approximate_gelu):
    # x_ref: (tm, C_in); w1_ref: (C_in, H); b1_ref: (1, H) f32
    # w2_ref: (H, C_out); b2_ref: (1, C_out) f32; o_ref: (tm, C_out)
    h = jnp.dot(x_ref[...], w1_ref[...], preferred_element_type=jnp.float32)
    h = h + b1_ref[...]
    h = _gelu(h, approximate_gelu)
    # dropout(p=0.0) -> identity
    # TODO(synk): stochastic dropout (p>0, training mode) not implemented; module default p=0.0.
    out = jnp.dot(h.astype(w2_ref.dtype), w2_ref[...],
                  preferred_element_type=jnp.float32)
    out = out + b2_ref[...]
    o_ref[...] = out.astype(o_ref.dtype)


def _mlp_kernel_htiled(x_ref, w1_ref, b1_ref, w2_ref, b2_ref, o_ref, acc_ref, *,
                       approximate_gelu):
    # Grid = (rows, hidden slabs); hidden axis is a reduction ("arbitrary", last).
    # x_ref: (tm, C_in); w1_ref: (C_in, th); b1_ref: (1, th) f32
    # w2_ref: (th, C_out); b2_ref: (1, C_out) f32; o_ref: (tm, C_out)
    # acc_ref: (tm, C_out) f32 scratch, persists across the hidden axis.
    j = pl.program_id(1)

    @pl.when(j == 0)
    def _():
        acc_ref[...] = jnp.zeros_like(acc_ref)

    h = jnp.dot(x_ref[...], w1_ref[...], preferred_element_type=jnp.float32)
    h = h + b1_ref[...]
    h = _gelu(h, approximate_gelu)
    acc_ref[...] += jnp.dot(h.astype(w2_ref.dtype), w2_ref[...],
                            preferred_element_type=jnp.float32)

    @pl.when(j == pl.num_programs(1) - 1)
    def _():
        o_ref[...] = (acc_ref[...] + b2_ref[...]).astype(o_ref.dtype)


# ----------------------------- planning -----------------------------

def _vmem_cap_bytes():
    """~85% of this chip's physical VMEM (headroom for compiler scratch/semaphores)."""
    try:
        phys = int(pltpu.get_tpu_info().vmem_capacity_bytes)
    except Exception:
        phys = 64 * 2 ** 20  # conservative default: v7x per-TensorCore VMEM
    return max(16 * 2 ** 20, int(phys * 0.85))


def _bytes_resident(tm, c_in, h, c_out, c_sz, o_sz):
    # weights: assume 2 buffers (worst case, no pipeline_mode tricks); biases f32
    wgt = 2 * (c_in * h + h * c_out) * c_sz + 2 * (h + c_out) * 4
    io = 2 * tm * c_in * c_sz + 2 * tm * c_out * o_sz
    inter = tm * h * (4 + c_sz) + tm * c_out * 4
    return wgt + io + inter


def _bytes_htiled(tm, th, c_in, c_out, c_sz, o_sz):
    wgt = 2 * (c_in * th + th * c_out) * c_sz + 2 * (th + c_out) * 4
    io = 2 * tm * c_in * c_sz + 2 * tm * c_out * o_sz
    inter = tm * th * (4 + c_sz) + 2 * tm * c_out * 4  # slab temp + f32 acc scratch
    return wgt + io + inter


def _choose_tm(m, tm_req, row_align):
    """MXU-aligned row tile; guarantees >=2 grid steps when M spans >1 tile (v7x megacore)."""
    tm_req = max(int(tm_req), row_align)
    if m <= 128:
        return min(_round_up(m, row_align), _round_up(tm_req, row_align))
    tm = max(128, (tm_req // 128) * 128)
    tm = min(tm, _round_up(m, 128))
    if _round_up(m, tm) // tm < 2:
        tm = max(128, _round_up((m + 1) // 2, 128))
    return tm


# ----------------------------- wrapper -----------------------------

def mlp_pallas(x, w1, b1, w2, b2, *, tm=256, h_tile=None,
               approximate_gelu=False, mxu_dtype=jnp.bfloat16):
    """x: (..., C_in) -> (..., C_out). Weights stored (in, out) so kernel does x @ W.

    mxu_dtype: dtype fed to the MXU (default bf16 -> full MXU rate; accumulation is
    always f32). Pass jnp.float32 for closest parity with the torch f32 module.
    h_tile: force the hidden-tiled accumulator plan with this slab width.
    """
    orig_shape = x.shape
    c_in = orig_shape[-1]
    h_dim = w1.shape[1]
    c_out = w2.shape[1]
    m = 1
    for d in orig_shape[:-1]:
        m *= int(d)

    compute_dtype = jnp.dtype(mxu_dtype) if mxu_dtype is not None else jnp.dtype(x.dtype)
    out_dtype = x.dtype
    c_sz = compute_dtype.itemsize
    o_sz = jnp.dtype(out_dtype).itemsize
    row_align = 16 if c_sz < 4 else 8

    tm_eff = _choose_tm(m, tm, row_align)
    m_pad = _round_up(m, tm_eff)

    x2d = x.reshape(m, c_in).astype(compute_dtype)
    if m_pad != m:
        x2d = jnp.pad(x2d, ((0, m_pad - m), (0, 0)))
    w1c = w1.astype(compute_dtype)
    w2c = w2.astype(compute_dtype)
    b1r = b1.reshape(1, h_dim).astype(jnp.float32)
    b2r = b2.reshape(1, c_out).astype(jnp.float32)

    cap = _vmem_cap_bytes()
    resident_need = int(1.25 * _bytes_resident(tm_eff, c_in, h_dim, c_out, c_sz, o_sz))
    use_htiled = (h_tile is not None) or (resident_need > cap)

    if not use_htiled:
        vmem_limit = int(min(cap, max(resident_need, 16 * 2 ** 20)))
        out2d = pl.pallas_call(
            functools.partial(_mlp_kernel_resident, approximate_gelu=approximate_gelu),
            out_shape=jax.ShapeDtypeStruct((m_pad, c_out), out_dtype),
            grid=(m_pad // tm_eff,),
            in_specs=[
                pl.BlockSpec((tm_eff, c_in), lambda i: (i, 0)),   # x row tile (streamed)
                pl.BlockSpec((c_in, h_dim), lambda i: (0, 0)),    # fc1 weight (resident)
                pl.BlockSpec((1, h_dim), lambda i: (0, 0)),       # fc1 bias
                pl.BlockSpec((h_dim, c_out), lambda i: (0, 0)),   # fc2 weight (resident)
                pl.BlockSpec((1, c_out), lambda i: (0, 0)),       # fc2 bias
            ],
            out_specs=pl.BlockSpec((tm_eff, c_out), lambda i: (i, 0)),
            compiler_params=pltpu.CompilerParams(
                dimension_semantics=("parallel",),
                vmem_limit_bytes=vmem_limit),
        )(x2d, w1c, b1r, w2c, b2r)
    else:
        h_max = _round_up(h_dim, 128)
        if h_tile is not None:
            th = min(_round_up(int(h_tile), 128), h_max)
        else:
            th = min(512, h_max)
            while th > 128 and int(1.25 * _bytes_htiled(tm_eff, th, c_in, c_out, c_sz, o_sz)) > cap:
                th = max(128, ((th // 2) // 128) * 128)
        h_pad = _round_up(h_dim, th)
        if h_pad != h_dim:
            # zero-padded hidden columns contribute GELU(0)=0, times zero rows of w2 -> exact.
            w1c = jnp.pad(w1c, ((0, 0), (0, h_pad - h_dim)))
            b1r = jnp.pad(b1r, ((0, 0), (0, h_pad - h_dim)))
            w2c = jnp.pad(w2c, ((0, h_pad - h_dim), (0, 0)))
        htiled_need = int(1.25 * _bytes_htiled(tm_eff, th, c_in, c_out, c_sz, o_sz))
        vmem_limit = int(min(cap, max(htiled_need, 16 * 2 ** 20)))
        out2d = pl.pallas_call(
            functools.partial(_mlp_kernel_htiled, approximate_gelu=approximate_gelu),
            out_shape=jax.ShapeDtypeStruct((m_pad, c_out), out_dtype),
            grid=(m_pad // tm_eff, h_pad // th),
            in_specs=[
                pl.BlockSpec((tm_eff, c_in), lambda i, j: (i, 0)),  # x row tile
                pl.BlockSpec((c_in, th), lambda i, j: (0, j)),      # fc1 weight slab
                pl.BlockSpec((1, th), lambda i, j: (0, j)),         # fc1 bias slab
                pl.BlockSpec((th, c_out), lambda i, j: (j, 0)),     # fc2 weight slab
                pl.BlockSpec((1, c_out), lambda i, j: (0, 0)),      # fc2 bias
            ],
            out_specs=pl.BlockSpec((tm_eff, c_out), lambda i, j: (i, 0)),
            scratch_shapes=[pltpu.VMEM((tm_eff, c_out), jnp.float32)],
            compiler_params=pltpu.CompilerParams(
                dimension_semantics=("parallel", "arbitrary"),
                vmem_limit_bytes=vmem_limit),
        )(x2d, w1c, b1r, w2c, b2r)

    if m_pad != m:
        out2d = out2d[:m]
    return out2d.reshape(*orig_shape[:-1], c_out)


# ----------------------------- reference / init -----------------------------

def init_mlp_params(key, in_features, hidden_features, out_features, dtype=jnp.float32):
    """Deterministic init mimicking nn.Linear defaults (uniform +-1/sqrt(fan_in))."""
    k1, k2, k3, k4 = jax.random.split(key, 4)
    lim1 = 1.0 / float(in_features) ** 0.5
    lim2 = 1.0 / float(hidden_features) ** 0.5
    # Stored as (in, out) so the kernel does x @ W directly (PyTorch stores (out, in)).
    w1 = jax.random.uniform(k1, (in_features, hidden_features), dtype, -lim1, lim1)
    b1 = jax.random.uniform(k2, (hidden_features,), dtype, -lim1, lim1)
    w2 = jax.random.uniform(k3, (hidden_features, out_features), dtype, -lim2, lim2)
    b2 = jax.random.uniform(k4, (out_features,), dtype, -lim2, lim2)
    return w1, b1, w2, b2


def mlp_ref(x, w1, b1, w2, b2):
    """Plain-JAX reference (high-precision matmuls) for correctness checking."""
    hp = jax.lax.Precision.HIGHEST
    h = jnp.dot(x, w1, precision=hp) + b1
    h = 0.5 * h * (1.0 + jax.lax.erf(h * _SQRT_HALF))
    return jnp.dot(h, w2, precision=hp) + b2


if __name__ == "__main__":
    key = jax.random.PRNGKey(0)
    kx, kp, kx2, kp2, kx3 = jax.random.split(key, 5)

    # Case 1: small ViT-MLP shapes, default bf16-MXU path.
    B, N, C_in = 2, 8, 32
    hidden, C_out = 64, 32
    x = jax.random.normal(kx, (B, N, C_in), dtype=jnp.float32)
    w1, b1, w2, b2 = init_mlp_params(kp, C_in, hidden, C_out)

    out = jax.block_until_ready(mlp_pallas(x, w1, b1, w2, b2))
    ref = mlp_ref(x, w1, b1, w2, b2)
    assert out.shape == (B, N, C_out)
    assert jnp.allclose(out, ref, atol=5e-2, rtol=5e-2), "mismatch (bf16 MXU path)"

    # Case 2: same shapes, f32 MXU operands (closest to torch f32 module).
    out_f32 = jax.block_until_ready(mlp_pallas(x, w1, b1, w2, b2, mxu_dtype=jnp.float32))
    assert jnp.allclose(out_f32, ref, atol=1e-3, rtol=1e-3), "mismatch (f32 path)"

    # Case 3: ragged token count -> padded, multi-step M grid.
    x2 = jax.random.normal(kx2, (2, 37, C_in), dtype=jnp.float32)
    out2 = jax.block_until_ready(mlp_pallas(x2, w1, b1, w2, b2, tm=32))
    ref2 = mlp_ref(x2, w1, b1, w2, b2)
    assert out2.shape == (2, 37, C_out)
    assert jnp.allclose(out2, ref2, atol=5e-2, rtol=5e-2), "mismatch (ragged M)"

    # Case 4: force the hidden-tiled accumulator plan (2 hidden slabs), f32 check.
    C4, H4 = 64, 256
    x3 = jax.random.normal(kx3, (2, 16, C4), dtype=jnp.float32)
    w1b, b1b, w2b, b2b = init_mlp_params(kp2, C4, H4, C4)
    out3 = jax.block_until_ready(
        mlp_pallas(x3, w1b, b1b, w2b, b2b, h_tile=128, mxu_dtype=jnp.float32))
    ref3 = mlp_ref(x3, w1b, b1b, w2b, b2b)
    assert out3.shape == (2, 16, C4)
    assert jnp.allclose(out3, ref3, atol=1e-3, rtol=1e-3), "mismatch (H-tiled path)"

    print("KERNEL_OK")
</pallas_src>

<mosaic_0001>
module attributes {stable_mosaic.version = 11 : i64} {
  func.func @_mlp_kernel_resident(%arg0: i32, %arg1: memref<16x32xbf16, #tpu.memory_space<vmem>>, %arg2: memref<32x64xbf16, #tpu.memory_space<vmem>>, %arg3: memref<1x64xf32, #tpu.memory_space<vmem>>, %arg4: memref<64x32xbf16, #tpu.memory_space<vmem>>, %arg5: memref<1x32xf32, #tpu.memory_space<vmem>>, %arg6: memref<16x32xf32, #tpu.memory_space<vmem>>) attributes {dimension_semantics = [#tpu.dimension_semantics<parallel>], iteration_bounds = array<i64: 1>, scalar_prefetch = 0 : i64, scratch_operands = 0 : i64, tpu.core_type = #tpu.core_type<tc>, window_params = [{transform_indices = @transform_0, window_bounds = array<i64: 16, 32>}, {pipeline_mode = #tpu.pipeline_mode<synchronous>, transform_indices = @transform_1, window_bounds = array<i64: 32, 64>}, {pipeline_mode = #tpu.pipeline_mode<synchronous>, transform_indices = @transform_2, window_bounds = array<i64: 1, 64>}, {pipeline_mode = #tpu.pipeline_mode<synchronous>, transform_indices = @transform_3, window_bounds = array<i64: 64, 32>}, {pipeline_mode = #tpu.pipeline_mode<synchronous>, transform_indices = @transform_4, window_bounds = array<i64: 1, 32>}, {transform_indices = @transform_5, window_bounds = array<i64: 16, 32>}]} {
    %c0 = arith.constant 0 : index
    %c0_0 = arith.constant 0 : index
    %0 = vector.load %arg1[%c0, %c0_0] : memref<16x32xbf16, #tpu.memory_space<vmem>>, vector<16x32xbf16>
    %c0_1 = arith.constant 0 : index
    %c0_2 = arith.constant 0 : index
    %1 = vector.load %arg2[%c0_1, %c0_2] : memref<32x64xbf16, #tpu.memory_space<vmem>>, vector<32x64xbf16>
    %cst = arith.constant dense<0.000000e+00> : vector<16x64xf32>
    %2 = tpu.matmul %0, %1, %cst {dimension_numbers = #tpu.dot_dimension_numbers<[1], [0], [0], [1], [0, 0, 1, 1], [], []>} : vector<16x32xbf16>, vector<32x64xbf16>, vector<16x64xf32> -> vector<16x64xf32>
    %c0_3 = arith.constant 0 : index
    %c0_4 = arith.constant 0 : index
    %3 = vector.load %arg3[%c0_3, %c0_4] : memref<1x64xf32, #tpu.memory_space<vmem>>, vector<1x64xf32>
    %4 = vector.broadcast %3 : vector<1x64xf32> to vector<16x64xf32>
    %5 = arith.addf %2, %4 : vector<16x64xf32>
    %cst_5 = arith.constant 5.000000e-01 : f32
    %6 = vector.broadcast %cst_5 : f32 to vector<16x64xf32>
    %7 = arith.mulf %6, %5 : vector<16x64xf32>
    %cst_6 = arith.constant 0.707106769 : f32
    %8 = vector.broadcast %cst_6 : f32 to vector<16x64xf32>
    %9 = arith.mulf %5, %8 : vector<16x64xf32>
    %10 = math.erf %9 : vector<16x64xf32>
    %cst_7 = arith.constant 1.000000e+00 : f32
    %11 = vector.broadcast %cst_7 : f32 to vector<16x64xf32>
    %12 = arith.addf %11, %10 : vector<16x64xf32>
    %13 = arith.mulf %7, %12 : vector<16x64xf32>
    %14 = arith.truncf %13 : vector<16x64xf32> to vector<16x64xbf16>
    %c0_8 = arith.constant 0 : index
    %c0_9 = arith.constant 0 : index
    %15 = vector.load %arg4[%c0_8, %c0_9] : memref<64x32xbf16, #tpu.memory_space<vmem>>, vector<64x32xbf16>
    %cst_10 = arith.constant dense<0.000000e+00> : vector<16x32xf32>
    %16 = tpu.matmul %14, %15, %cst_10 {dimension_numbers = #tpu.dot_dimension_numbers<[1], [0], [0], [1], [0, 0, 1, 1], [], []>} : vector<16x64xbf16>, vector<64x32xbf16>, vector<16x32xf32> -> vector<16x32xf32>
    %c0_11 = arith.constant 0 : index
    %c0_12 = arith.constant 0 : index
    %17 = vector.load %arg5[%c0_11, %c0_12] : memref<1x32xf32, #tpu.memory_space<vmem>>, vector<1x32xf32>
    %18 = vector.broadcast %17 : vector<1x32xf32> to vector<16x32xf32>
    %19 = arith.addf %16, %18 : vector<16x32xf32>
    %c0_13 = arith.constant 0 : index
    %c0_14 = arith.constant 0 : index
    %20 = vector.load %arg6[%c0_13, %c0_14] : memref<16x32xf32, #tpu.memory_space<vmem>>, vector<16x32xf32>
    tpu.vector_store %arg6[%c0_13, %c0_14], %19 {strides = array<i32>} : memref<16x32xf32, #tpu.memory_space<vmem>>, vector<16x32xf32>,
    return
  }
  func.func @transform_0(%arg0: i32) -> (i32, i32) {
    %c0_i32 = arith.constant 0 : i32
    %c0_i32_0 = arith.constant 0 : i32
    return %arg0, %c0_i32 : i32, i32
  }
  func.func @transform_1(%arg0: i32) -> (i32, i32) {
    %c0_i32 = arith.constant 0 : i32
    %c0_i32_0 = arith.constant 0 : i32
    %c0_i32_1 = arith.constant 0 : i32
    return %c0_i32, %c0_i32_0 : i32, i32
  }
  func.func @transform_2(%arg0: i32) -> (i32, i32) {
    %c0_i32 = arith.constant 0 : i32
    %c0_i32_0 = arith.constant 0 : i32
    %c0_i32_1 = arith.constant 0 : i32
    return %c0_i32, %c0_i32_0 : i32, i32
  }
  func.func @transform_3(%arg0: i32) -> (i32, i32) {
    %c0_i32 = arith.constant 0 : i32
    %c0_i32_0 = arith.constant 0 : i32
    %c0_i32_1 = arith.constant 0 : i32
    return %c0_i32, %c0_i32_0 : i32, i32
  }
  func.func @transform_4(%arg0: i32) -> (i32, i32) {
    %c0_i32 = arith.constant 0 : i32
    %c0_i32_0 = arith.constant 0 : i32
    %c0_i32_1 = arith.constant 0 : i32
    return %c0_i32, %c0_i32_0 : i32, i32
  }
  func.func @transform_5(%arg0: i32) -> (i32, i32) {
    %c0_i32 = arith.constant 0 : i32
    %c0_i32_0 = arith.constant 0 : i32
    return %arg0, %c0_i32 : i32, i32
  }
}

</mosaic_0001>

<bundles_post_ra>
// kernel: tpu_custom_call.1
= control target key start
LH: loop header
LB: loop body
LE: loop exit
PB: predicated region body
PF: predicated region fallthrough
CT: control target
= control target key end

     0   :  { %v287_v1 = vmov 0.0   ;;  %vm288_vm0 = vmmov 0   ;;  %vm52_vm1 = vcmask 261120   ;;  %s355_s0 = inlined_call_operand.vmem [shape: bf16[16,32], index: 0, kind: input, shape index: {}]   ;;  %s356_s1 = inlined_call_operand.vmem [shape: bf16[32,64], index: 1, kind: input, shape index: {}]   ;;  %s357_s2 = inlined_call_operand.vmem [shape: f32[1,64], index: 2, kind: input, shape index: {}]   ;;  %s358_s3 = inlined_call_operand.vmem [shape: bf16[64,32], index: 3, kind: input, shape index: {}]   ;;  %s359_s4 = inlined_call_operand.vmem [shape: f32[1,32], index: 4, kind: input, shape index: {}]   ;;  %s360_s5 = inlined_call_operand.hbm [shape: f32[16,32], index: 5, kind: output, shape index: {}]  }
   0x1   :  { %v254_v0 = vld [vmem:[%s356_s1 + $0x8] sm:$0xff]   ;;  %229 = vmatprep.subr.bf16.mxu0 %v287_v1  ;;  %237 = vmatprep.subr.bf16.mxu1 %v287_v1  ;;  %v255_v2 = vld [vmem:[%s356_s1] sm:$0xff]  }
   0x2   :  { %230 = vmatpush3.bf16.msra.mxu0 %v254_v0  ;;  %233 = vmatprep.mubr.msk.bf16.mxu0 %vm288_vm0, %v287_v1  ;;  %v256_v3 = vld [vmem:[%s355_s0] sm:$0xff]  }
   0x3   :  { %231 = vmatprep.subr.bf16.mxu0 %v287_v1  ;;  %245 = vmatprep.mubr.msk.bf16.mxu1 %vm288_vm0, %v287_v1 }
   0x6   :  { %232 = vmatpush3.bf16.msra.mxu0 %v255_v2 }
   0x7   :  { %10 = vsyncpa [#allocation3], 0  ;;  %v257_v4 = vld [vmem:[%s358_s3 + $0x18] sm:$0xff]   ;;  %v258_v5 = vld [vmem:[%s358_s3 + $0x10] sm:$0xff]   ;;  %vm147_vm2 = vcmask 523264   ;;  %s289_s7 = smov [#allocation2]  }
   0x8   :  { %238 = vmatpush3.bf16.msra.mxu1 %v257_v4  ;;  %v259_v6 = vld [vmem:[%s358_s3 + $0x8] sm:$0xff]   ;;  %v260_v7 = vld [vmem:[%s358_s3] sm:$0xff]   ;;  %s199_s8 = sshll.u32 %s289_s7, 4  ;;  %s200_s8 = int_to_ptr.vmem [resolvable:$true] %s199_s8 }
   0x9   :  { %234 = vmatmul.mubr.msk.bf16.vlgmr.msra.gmra.mxu0 %vm52_vm1, %v256_v3  ;;  %239 = vmatprep.subr.bf16.mxu1 %v287_v1  ;;  %v210_v8 = vld [vmem:[%s357_s2] ss:$0 sm:$0xff]  ;;  %s265_s9 = scalar_lea.vmem %s200_s8, 256  ;;  %p270_p1 = scmp.lt.s32.totalorder %s200_s8, %s200_s8 }
   0xa   :  { %v215_v26 = vld [vmem:[%s359_s4] ss:$0 sm:$0xff]  ;;  %p266_p0 = scmp.ne.s32.totalorder %s200_s8, %s265_s9  ;;  %p271_p2 = scmp.lt.s32.totalorder %s265_s9, %s265_s9 }
   0xc   :  { %240 = vmatpush3.bf16.msra.mxu1 %v258_v5  ;;  %p272_p3 = por %p271_p2, %p270_p1 }
   0xd   :  { %241 = vmatprep.subr.bf16.mxu1 %v287_v1 }
   0xe   :  { %p273_p4 = pnand %p272_p3, %p266_p0 }
  0x10   :  { %242 = vmatpush3.bf16.msra.mxu1 %v259_v6 }
  0x11   :  { %243 = vmatprep.subr.bf16.mxu1 %v287_v1 }
  0x14   :  { %244 = vmatpush3.bf16.msra.mxu1 %v260_v7 }
  0xc9   :  { %v90_v9 = vpop.f32.mrf.mxu0 }
  0xca   :  { %v91_v10 = vadd.f32 %v210_v8, %v90_v9 }
  0xcb   :  { %v235_v11 = vpop.f32.mrf.mxu0 }
  0xcc   :  { %v99_v12 = vmul.f32 0.70710677, %v91_v10  ;;  %v97_v20 = vmul.f32 0.5, %v91_v10 }
  0xcd   :  { %v93_v13 = vpop.f32.mrf.mxu0 }
  0xce   :  { %261 = verf.f32 %v99_v12  ;;  %v94_v14 = vadd.f32 %v210_v8, %v93_v13 }
  0xcf   :  { %v236_v15 = vpop.f32.mrf.mxu0 }
  0xd0   :  { %v100_v16 = vmul.f32 0.70710677, %v94_v14  ;;  %v98_v21 = vmul.f32 0.5, %v94_v14 }
  0xd2   :  { %263 = verf.f32 %v100_v16 }
  0xdb   :  { %v262_v17 = vpop.eup %261 }
  0xdc   :  { %v103_v18 = vadd.f32 1.0, %v262_v17 }
  0xde   :  { %v105_v23 = vmul.f32 %v103_v18, %v97_v20 }
  0xdf   :  { %v264_v19 = vpop.eup %263 }
  0xe0   :  { %v104_v22 = vadd.f32 1.0, %v264_v19 }
  0xe2   :  { %v106_v24 = vmul.f32 %v104_v22, %v98_v21 }
  0xe4   :  { %v107_v25 = vpack.c.bf16 %v106_v24, %v105_v23 }
  0xe6   :  { %246 = vmatmul.mubr.msk.bf16.vlgmr.msra.gmra.mxu1 %vm147_vm2, %v107_v25 }
 0x1a6   :  { %v185_v27 = vpop.f32.mrf.mxu1 }
 0x1a7   :  { %v186_v28 = vadd.f32 %v215_v26, %v185_v27 }
 0x1a8   :  { %v247_v29 = vpop.f32.mrf.mxu1 }
 0x1a9   :  { %192 = vst.msk [vmem:[#allocation2] sm:$0xff] %vm52_vm1, %v186_v28 }
 0x1aa   :  { %v188_v30 = vpop.f32.mrf.mxu1 }
 0x1ab   :  { %v189_v31 = vadd.f32 %v215_v26, %v188_v30 }
 0x1ac   :  { %v248_v32 = vpop.f32.mrf.mxu1 }
 0x1ad   :  { %193 = vst.msk [vmem:[#allocation2 + $0x8] sm:$0xff] %vm52_vm1, %v189_v31 }
 0x1ae   :  { %276 = shalt.err (!%p273_p4)
}
 0x1af   :  { %s290_s4 = smov 128   ;;  %s291_s10 = smov 8  }
 0x1b0   :  { %205 = dma.vmem_to_hbm [thread:$0]  %s200_s8, 256, %s360_s5, [#allocation3], %s290_s4, %s290_s4, %s291_s10  }
 0x1b1   :  { %285 = dma.done.wait [#allocation3], 256  }
 0x1b2   :  { %286 = vsyncadd [#allocation3], 4294967040 }
 0x1b3   :  { %209 = vsyncpa [#allocation3], 1 }

</bundles_post_ra>
